<compile_context>
chip_gen: v5e
topology: v5e:2x2
jax: 0.10.0
libtpu: 0.0.40
codegen_flags: <defaults>
</compile_context>

<pallas_src>
import functools

import jax
import jax.numpy as jnp
from jax.experimental import pallas as pl
from jax.experimental.pallas import tpu as pltpu

LANE = 128

# Physical VMEM (v7x: 64 MiB, v5e/v6e: 128 MiB); conservative default if query fails.
try:
    _PHYS_VMEM = int(getattr(pltpu.get_tpu_info(), "vmem_capacity_bytes", 64 << 20))
except Exception:  # pragma: no cover
    _PHYS_VMEM = 64 << 20
_VMEM_BUDGET = (_PHYS_VMEM * 3) // 4      # leave headroom for compiler scratch
_RESIDENT_SRC_CAP = 20 << 20              # cap resident src features (v7x-safe)


def _round_up(x, m):
    return (x + m - 1) // m * m


def _pick_tile(n_p, want_parallel):
    """Largest 128*2^k tile <= 512 dividing n_p; keep >=2 dst tiles when asked
    (so the 'parallel' dst axis can be sharded across v7x's two TensorCores)."""
    for t in (512, 256, 128):
        if t <= n_p and n_p % t == 0:
            if want_parallel and t > 128 and n_p // t < 2:
                continue
            return t
    return 128


def _vmem_bytes(tm, tk, n_p, f_in_p, f_out_p, src_resident):
    """Conservative VMEM estimate (all BlockSpec operands counted double-buffered)."""
    adj = 2 * tm * tk * 2                                    # bf16 adjacency tile
    h_src = 2 * (n_p if src_resident else tk) * f_in_p * 2   # bf16 src features
    h_dst = 2 * tm * f_in_p * 2                              # bf16 dst features
    inv = 2 * tm * 4                                         # f32 1/deg
    w = 2 * 2 * f_in_p * f_out_p * 2                         # two bf16 weight blocks
    b = 2 * f_out_p * 4                                      # f32 bias
    out = 2 * tm * f_out_p * 4                               # f32 output tile
    acc = tm * f_in_p * 4                                    # f32 accumulator scratch
    return adj + h_src + h_dst + inv + w + b + out + acc


def sageconv_kernel(adj_ref, h_src_ref, h_dst_ref, inv_deg_ref,
                    w_self_ref, w_neigh_ref, b_ref, o_ref, acc_ref,
                    *, tk, src_resident):
    """Grid = (dst tiles ["parallel"], src tiles ["arbitrary" reduction])."""
    k = pl.program_id(1)

    @pl.when(k == 0)
    def _init():
        acc_ref[...] = jnp.zeros_like(acc_ref)

    if src_resident:
        # Src features resident in VMEM for the whole grid; take this step's slab.
        start = pl.multiple_of(k * tk, tk)
        h_src = h_src_ref[pl.ds(start, tk), :]
    else:
        h_src = h_src_ref[...]

    # Partial neighbor sum: (TM, TK) bf16 x (TK, F_in_p) bf16 -> f32 accumulate.
    acc_ref[...] += jnp.dot(adj_ref[...], h_src,
                            preferred_element_type=jnp.float32)

    @pl.when(k == pl.num_programs(1) - 1)
    def _finalize():
        # Mean over in-neighbors; inv_deg is 0 for isolated nodes -> h_N = 0.
        h_n = (acc_ref[...] * inv_deg_ref[...]).astype(jnp.bfloat16)
        # Concat-free projection: h @ W_self + h_N @ W_neigh + b  (two MXU dots,
        # no (TM, 2*F_in) intermediate copy in VMEM).
        out = jnp.dot(h_dst_ref[...], w_self_ref[...],
                      preferred_element_type=jnp.float32)
        out = out + jnp.dot(h_n, w_neigh_ref[...],
                            preferred_element_type=jnp.float32)
        o_ref[...] = (out + b_ref[...]).astype(o_ref.dtype)


@jax.jit
def sageconv_forward(adj, h, weight, bias):
    """adj: (N, N) f32 with adj[dst, src]=1 for edges, h: (N, F_in) f32,
    weight: (F_out, 2*F_in) f32 (PyTorch nn.Linear layout), bias: (F_out,) f32."""
    n, f_in = h.shape
    f_out = weight.shape[0]
    assert adj.shape == (n, n)
    assert weight.shape == (f_out, 2 * f_in)

    # ---- lane-dense zero padding (exact: padded rows/cols/features are zero) ----
    n_p = _round_up(n, LANE)
    f_in_p = _round_up(f_in, LANE)
    f_out_p = _round_up(f_out, LANE)

    tm = _pick_tile(n_p, want_parallel=True)
    tk = _pick_tile(n_p, want_parallel=False)
    src_resident = (2 * n_p * f_in_p * 2 <= _RESIDENT_SRC_CAP and
                    _vmem_bytes(tm, tk, n_p, f_in_p, f_out_p, True) <= _VMEM_BUDGET)
    # Shrink residency / tiles if the VMEM budget (e.g. v7x's 64 MiB) is exceeded.
    while _vmem_bytes(tm, tk, n_p, f_in_p, f_out_p, src_resident) > _VMEM_BUDGET:
        if src_resident:
            src_resident = False
        elif tk > 128:
            tk //= 2
        elif tm > 128:
            tm //= 2
        else:
            break

    adj_p = jnp.pad(adj, ((0, n_p - n), (0, n_p - n)))
    # Single bf16 padded feature array, used both as src and dst/self operand.
    h_bf16 = jnp.pad(h, ((0, n_p - n), (0, f_in_p - f_in))).astype(jnp.bfloat16)

    # Exact per-node 1/in-degree (0 for isolated nodes), computed once in f32.
    deg = jnp.sum(adj_p, axis=1, keepdims=True)                       # (Np, 1)
    inv_deg = jnp.where(deg > 0.0, 1.0 / jnp.maximum(deg, 1.0), 0.0)

    # Split the concat-linear into self/neighbor halves, pre-transpose to
    # (F_in_p, F_out_p), pad, and cast to bf16 for the projection dots.
    w_self = jnp.pad(weight[:, :f_in].T,
                     ((0, f_in_p - f_in), (0, f_out_p - f_out))).astype(jnp.bfloat16)
    w_neigh = jnp.pad(weight[:, f_in:].T,
                      ((0, f_in_p - f_in), (0, f_out_p - f_out))).astype(jnp.bfloat16)
    b_p = jnp.pad(bias.reshape(1, f_out), ((0, 0), (0, f_out_p - f_out)))

    adj_bf16 = adj_p.astype(jnp.bfloat16)   # 0/1 values -> exact in bf16

    grid = (n_p // tm, n_p // tk)
    dst_tiles = grid[0]

    flops = 2 * n_p * n_p * f_in_p + 2 * 2 * n_p * f_in_p * f_out_p
    bytes_accessed = (
        n_p * n_p * 2                                             # adjacency (read once)
        + (1 if src_resident else dst_tiles) * n_p * f_in_p * 2   # src features
        + n_p * f_in_p * 2                                        # dst features (once/dst tile)
        + n_p * 4 + 2 * f_in_p * f_out_p * 2 + f_out_p * 4        # inv_deg, weights, bias
        + n_p * f_out_p * 4                                       # output
    )

    if src_resident:
        h_src_spec = pl.BlockSpec((n_p, f_in_p), lambda i, k: (0, 0))   # fetched once
    else:
        h_src_spec = pl.BlockSpec((tk, f_in_p), lambda i, k: (k, 0))    # streamed per k

    # TODO(synk): for genuinely sparse graphs, add scalar-prefetch per-dst-tile
    # lists of nonzero src-column blocks and skip all-zero adjacency tiles.
    kernel = functools.partial(sageconv_kernel, tk=tk, src_resident=src_resident)

    out_p = pl.pallas_call(
        kernel,
        out_shape=jax.ShapeDtypeStruct((n_p, f_out_p), jnp.float32),
        grid_spec=pltpu.PrefetchScalarGridSpec(
            num_scalar_prefetch=0,
            grid=grid,
            in_specs=[
                pl.BlockSpec((tm, tk), lambda i, k: (i, k)),            # adjacency (bf16)
                h_src_spec,                                             # src features (bf16)
                pl.BlockSpec((tm, f_in_p), lambda i, k: (i, 0)),        # dst/self features (bf16)
                pl.BlockSpec((tm, 1), lambda i, k: (i, 0)),             # 1/deg per dst row (f32)
                pl.BlockSpec((f_in_p, f_out_p), lambda i, k: (0, 0)),   # W_self^T (bf16)
                pl.BlockSpec((f_in_p, f_out_p), lambda i, k: (0, 0)),   # W_neigh^T (bf16)
                pl.BlockSpec((1, f_out_p), lambda i, k: (0, 0)),        # bias (f32)
            ],
            out_specs=pl.BlockSpec((tm, f_out_p), lambda i, k: (i, 0)),
            scratch_shapes=[pltpu.VMEM((tm, f_in_p), jnp.float32)],     # neighbor-sum acc
        ),
        compiler_params=pltpu.CompilerParams(
            dimension_semantics=("parallel", "arbitrary"),
            vmem_limit_bytes=int(_VMEM_BUDGET),
        ),
        cost_estimate=pl.CostEstimate(flops=int(flops), transcendentals=0,
                                      bytes_accessed=int(bytes_accessed)),
    )(adj_bf16, h_bf16, h_bf16, inv_deg, w_self, w_neigh, b_p)

    return out_p[:n, :f_out]


def reference_forward(adj, h, weight, bias):
    """Pure-f32 reference of the module semantics."""
    deg = jnp.sum(adj, axis=1, keepdims=True)
    agg = adj @ h
    h_n = jnp.where(deg > 0.0, agg / jnp.maximum(deg, 1.0), 0.0)
    h_total = jnp.concatenate([h, h_n], axis=1)
    return h_total @ weight.T + bias


if __name__ == "__main__":
    key = jax.random.PRNGKey(0)
    k_feat, k_edge, k_w, k_b = jax.random.split(key, 4)

    # Small, deliberately non-aligned shapes to exercise the padding path.
    N = 200          # number of nodes
    IN_FEAT = 48
    OUT_FEAT = 96

    # Node features.
    h = jax.random.normal(k_feat, (N, IN_FEAT), dtype=jnp.float32)

    # Deterministic random directed graph -> dense adjacency A[dst, src].
    edge_probs = jax.random.uniform(k_edge, (N, N))
    adj = (edge_probs < 0.05).astype(jnp.float32)
    adj = adj * (1.0 - jnp.eye(N, dtype=jnp.float32))   # no self loops

    # nn.Linear(2*in_feat, out_feat) init: U(-1/sqrt(fan_in), 1/sqrt(fan_in)).
    fan_in = 2 * IN_FEAT
    bound = 1.0 / jnp.sqrt(jnp.float32(fan_in))
    weight = jax.random.uniform(k_w, (OUT_FEAT, 2 * IN_FEAT),
                                minval=-bound, maxval=bound, dtype=jnp.float32)
    bias = jax.random.uniform(k_b, (OUT_FEAT,),
                              minval=-bound, maxval=bound, dtype=jnp.float32)

    out = sageconv_forward(adj, h, weight, bias)
    out = jax.block_until_ready(out)

    ref = reference_forward(adj, h, weight, bias)
    assert out.shape == (N, OUT_FEAT)
    # bf16 aggregation/projection operands (f32 accumulation) vs pure-f32 reference.
    err = float(jnp.max(jnp.abs(out - ref)))
    assert jnp.allclose(out, ref, atol=2e-2, rtol=2e-2), err

    print("KERNEL_OK")
</pallas_src>

<mosaic_0001>
module attributes {stable_mosaic.version = 11 : i64} {
  func.func @sageconv_kernel(%arg0: i32, %arg1: i32, %arg2: memref<128x256xbf16, #tpu.memory_space<vmem>>, %arg3: memref<256x128xbf16, #tpu.memory_space<vmem>>, %arg4: memref<128x128xbf16, #tpu.memory_space<vmem>>, %arg5: memref<128x1xf32, #tpu.memory_space<vmem>>, %arg6: memref<128x128xbf16, #tpu.memory_space<vmem>>, %arg7: memref<128x128xbf16, #tpu.memory_space<vmem>>, %arg8: memref<1x128xf32, #tpu.memory_space<vmem>>, %arg9: memref<128x128xf32, #tpu.memory_space<vmem>>, %arg10: memref<128x128xf32, #tpu.memory_space<vmem>>) attributes {dimension_semantics = [#tpu.dimension_semantics<parallel>, #tpu.dimension_semantics<arbitrary>], iteration_bounds = array<i64: 2, 1>, scalar_prefetch = 0 : i64, scratch_operands = 1 : i64, tpu.core_type = #tpu.core_type<tc>, window_params = [{transform_indices = @transform_0, window_bounds = array<i64: 128, 256>}, {pipeline_mode = #tpu.pipeline_mode<synchronous>, transform_indices = @transform_1, window_bounds = array<i64: 256, 128>}, {transform_indices = @transform_2, window_bounds = array<i64: 128, 128>}, {transform_indices = @transform_3, window_bounds = array<i64: 128, 1>}, {pipeline_mode = #tpu.pipeline_mode<synchronous>, transform_indices = @transform_4, window_bounds = array<i64: 128, 128>}, {pipeline_mode = #tpu.pipeline_mode<synchronous>, transform_indices = @transform_5, window_bounds = array<i64: 128, 128>}, {pipeline_mode = #tpu.pipeline_mode<synchronous>, transform_indices = @transform_6, window_bounds = array<i64: 1, 128>}, {transform_indices = @transform_7, window_bounds = array<i64: 128, 128>}]} {
    %c0_i32 = arith.constant 0 : i32
    %0 = arith.cmpi eq, %arg1, %c0_i32 : i32
    %1 = arith.extui %0 : i1 to i32
    %c0_i32_0 = arith.constant 0 : i32
    %2 = arith.cmpi ne, %1, %c0_i32_0 : i32
    scf.if %2 {
      %cst_9 = arith.constant 0.000000e+00 : f32
      %15 = vector.broadcast %cst_9 : f32 to vector<128x128xf32>
      %c0_10 = arith.constant 0 : index
      %c0_11 = arith.constant 0 : index
      %16 = vector.load %arg10[%c0_10, %c0_11] : memref<128x128xf32, #tpu.memory_space<vmem>>, vector<128x128xf32>
      tpu.vector_store %arg10[%c0_10, %c0_11], %15 {strides = array<i32>} : memref<128x128xf32, #tpu.memory_space<vmem>>, vector<128x128xf32>,
    } else {
    }
    %c256_i32 = arith.constant 256 : i32
    %3 = arith.muli %arg1, %c256_i32 : i32
    %4 = tpu.assume_multiple %3, 256 : i32
    %5 = arith.index_cast %4 : i32 to index
    %c0 = arith.constant 0 : index
    %6 = vector.load %arg3[%5, %c0] : memref<256x128xbf16, #tpu.memory_space<vmem>>, vector<256x128xbf16>
    %c0_1 = arith.constant 0 : index
    %c0_2 = arith.constant 0 : index
    %7 = vector.load %arg10[%c0_1, %c0_2] : memref<128x128xf32, #tpu.memory_space<vmem>>, vector<128x128xf32>
    %c0_3 = arith.constant 0 : index
    %c0_4 = arith.constant 0 : index
    %8 = vector.load %arg2[%c0_3, %c0_4] : memref<128x256xbf16, #tpu.memory_space<vmem>>, vector<128x256xbf16>
    %cst = arith.constant dense<0.000000e+00> : vector<128x128xf32>
    %9 = tpu.matmul %8, %6, %cst {dimension_numbers = #tpu.dot_dimension_numbers<[1], [0], [0], [1], [0, 0, 1, 1], [], []>} : vector<128x256xbf16>, vector<256x128xbf16>, vector<128x128xf32> -> vector<128x128xf32>
    %10 = arith.addf %7, %9 : vector<128x128xf32>
    %c0_5 = arith.constant 0 : index
    %c0_6 = arith.constant 0 : index
    %11 = vector.load %arg10[%c0_5, %c0_6] : memref<128x128xf32, #tpu.memory_space<vmem>>, vector<128x128xf32>
    tpu.vector_store %arg10[%c0_5, %c0_6], %10 {strides = array<i32>} : memref<128x128xf32, #tpu.memory_space<vmem>>, vector<128x128xf32>,
    %c0_i32_7 = arith.constant 0 : i32
    %12 = arith.cmpi eq, %arg1, %c0_i32_7 : i32
    %13 = arith.extui %12 : i1 to i32
    %c0_i32_8 = arith.constant 0 : i32
    %14 = arith.cmpi ne, %13, %c0_i32_8 : i32
    scf.if %14 {
      %c0_9 = arith.constant 0 : index
      %c0_10 = arith.constant 0 : index
      %15 = vector.load %arg10[%c0_9, %c0_10] : memref<128x128xf32, #tpu.memory_space<vmem>>, vector<128x128xf32>
      %c0_11 = arith.constant 0 : index
      %c0_12 = arith.constant 0 : index
      %16 = vector.load %arg5[%c0_11, %c0_12] : memref<128x1xf32, #tpu.memory_space<vmem>>, vector<128x1xf32>
      %17 = vector.broadcast %16 : vector<128x1xf32> to vector<128x128xf32>
      %18 = arith.mulf %15, %17 : vector<128x128xf32>
      %19 = arith.truncf %18 : vector<128x128xf32> to vector<128x128xbf16>
      %c0_13 = arith.constant 0 : index
      %c0_14 = arith.constant 0 : index
      %20 = vector.load %arg4[%c0_13, %c0_14] : memref<128x128xbf16, #tpu.memory_space<vmem>>, vector<128x128xbf16>
      %c0_15 = arith.constant 0 : index
      %c0_16 = arith.constant 0 : index
      %21 = vector.load %arg6[%c0_15, %c0_16] : memref<128x128xbf16, #tpu.memory_space<vmem>>, vector<128x128xbf16>
      %cst_17 = arith.constant dense<0.000000e+00> : vector<128x128xf32>
      %22 = tpu.matmul %20, %21, %cst_17 {dimension_numbers = #tpu.dot_dimension_numbers<[1], [0], [0], [1], [0, 0, 1, 1], [], []>} : vector<128x128xbf16>, vector<128x128xbf16>, vector<128x128xf32> -> vector<128x128xf32>
      %c0_18 = arith.constant 0 : index
      %c0_19 = arith.constant 0 : index
      %23 = vector.load %arg7[%c0_18, %c0_19] : memref<128x128xbf16, #tpu.memory_space<vmem>>, vector<128x128xbf16>
      %cst_20 = arith.constant dense<0.000000e+00> : vector<128x128xf32>
      %24 = tpu.matmul %19, %23, %cst_20 {dimension_numbers = #tpu.dot_dimension_numbers<[1], [0], [0], [1], [0, 0, 1, 1], [], []>} : vector<128x128xbf16>, vector<128x128xbf16>, vector<128x128xf32> -> vector<128x128xf32>
      %25 = arith.addf %22, %24 : vector<128x128xf32>
      %c0_21 = arith.constant 0 : index
      %c0_22 = arith.constant 0 : index
      %26 = vector.load %arg8[%c0_21, %c0_22] : memref<1x128xf32, #tpu.memory_space<vmem>>, vector<1x128xf32>
      %27 = vector.broadcast %26 : vector<1x128xf32> to vector<128x128xf32>
      %28 = arith.addf %25, %27 : vector<128x128xf32>
      %c0_23 = arith.constant 0 : index
      %c0_24 = arith.constant 0 : index
      %29 = vector.load %arg9[%c0_23, %c0_24] : memref<128x128xf32, #tpu.memory_space<vmem>>, vector<128x128xf32>
      tpu.vector_store %arg9[%c0_23, %c0_24], %28 {strides = array<i32>} : memref<128x128xf32, #tpu.memory_space<vmem>>, vector<128x128xf32>,
    } else {
    }
    return
  }
  func.func @transform_0(%arg0: i32, %arg1: i32) -> (i32, i32) {
    %c0_i32 = arith.constant 0 : i32
    return %arg0, %arg1 : i32, i32
  }
  func.func @transform_1(%arg0: i32, %arg1: i32) -> (i32, i32) {
    %c0_i32 = arith.constant 0 : i32
    %c0_i32_0 = arith.constant 0 : i32
    %c0_i32_1 = arith.constant 0 : i32
    return %c0_i32, %c0_i32_0 : i32, i32
  }
  func.func @transform_2(%arg0: i32, %arg1: i32) -> (i32, i32) {
    %c0_i32 = arith.constant 0 : i32
    %c0_i32_0 = arith.constant 0 : i32
    return %arg0, %c0_i32 : i32, i32
  }
  func.func @transform_3(%arg0: i32, %arg1: i32) -> (i32, i32) {
    %c0_i32 = arith.constant 0 : i32
    %c0_i32_0 = arith.constant 0 : i32
    return %arg0, %c0_i32 : i32, i32
  }
  func.func @transform_4(%arg0: i32, %arg1: i32) -> (i32, i32) {
    %c0_i32 = arith.constant 0 : i32
    %c0_i32_0 = arith.constant 0 : i32
    %c0_i32_1 = arith.constant 0 : i32
    return %c0_i32, %c0_i32_0 : i32, i32
  }
  func.func @transform_5(%arg0: i32, %arg1: i32) -> (i32, i32) {
    %c0_i32 = arith.constant 0 : i32
    %c0_i32_0 = arith.constant 0 : i32
    %c0_i32_1 = arith.constant 0 : i32
    return %c0_i32, %c0_i32_0 : i32, i32
  }
  func.func @transform_6(%arg0: i32, %arg1: i32) -> (i32, i32) {
    %c0_i32 = arith.constant 0 : i32
    %c0_i32_0 = arith.constant 0 : i32
    %c0_i32_1 = arith.constant 0 : i32
    return %c0_i32, %c0_i32_0 : i32, i32
  }
  func.func @transform_7(%arg0: i32, %arg1: i32) -> (i32, i32) {
    %c0_i32 = arith.constant 0 : i32
    %c0_i32_0 = arith.constant 0 : i32
    return %arg0, %c0_i32 : i32, i32
  }
}

</mosaic_0001>

<bundles_post_ra>
// kernel: sageconv_forward.1
= control target key start
LH: loop header
LB: loop body
LE: loop exit
PB: predicated region body
PF: predicated region fallthrough
CT: control target
= control target key end

     0   :  { %s1705_s24 = smov 0   ;;  %s1707_s25 = smov 0   ;;  %s1950_s0 = inlined_call_operand.vmem [shape: bf16[256,256], index: 0, kind: input, shape index: {}]   ;;  %s1951_s1 = inlined_call_operand.vmem [shape: bf16[256,128], index: 1, kind: input, shape index: {}, may-alias: {1,2}]   ;;  %s1952_s2 = inlined_call_operand.vmem [shape: bf16[256,128], index: 2, kind: input, shape index: {}, may-alias: {1,2}]   ;;  %s1953_s3 = inlined_call_operand.vmem [shape: f32[256,1], index: 3, kind: input, shape index: {}]   ;;  %s1954_s4 = inlined_call_operand.vmem [shape: bf16[128,128], index: 4, kind: input, shape index: {}]   ;;  %s1955_s5 = inlined_call_operand.vmem [shape: bf16[128,128], index: 5, kind: input, shape index: {}]   ;;  %s1956_s6 = inlined_call_operand.vmem [shape: f32[1,128], index: 6, kind: input, shape index: {}]   ;;  %s1957_s7 = inlined_call_operand.vmem [shape: f32[256,128], index: 7, kind: output, shape index: {}]  }
   0x1   :  { %s1709_s26 = smov 0  }
   0x2 LB: > { %s29_s27 = sadd.s32 1, %s1658_s25  ;;  %p1318_p0 = scmp.ge.s32.totalorder %s1662_s26, 1  ;;  %s1662_s26 = sphi %s1709_s26, %s17_s26   ;;  %s1658_s25 = sphi %s1707_s25, %s1959_s25   ;;  %s1654_s24 = sphi %s1705_s24, %s1958_s24  }
   0x3   : > { %p31_p1 = scmp.ge.s32.totalorder %s29_s27, 2  ;;  %p280_p2 = scmp.lt.s32.totalorder %s1662_s26, 3 }
   0x5   : > { %s1961_s27 = smov (%p31_p1, %s29_s27), 0  ;;  %p281_p3 = pnand %p1318_p0, %p280_p2 }
   0x6   : > { %s1319_s9 = sshll.u32 (!%p281_p3), %s1654_s24, 4 }
   0x7   : > { %284 = sbr.rel (%p281_p3) target bundleno = 442 (0x1ba), region = 48  ;;  %p329_p4 = scmp.lt.s32.totalorder (!%p281_p3), %s1319_s9, 31 }
   0xc   : > { %v1562_v0 = vld [vmem:[%s1951_s1 + $0x38] sm:$0xff]  ;;  %v1664_v2 = vmov 0   ;;  %v1561_v3 = vld [vmem:[%s1951_s1 + $0x30] sm:$0xff]  ;;  %s1963_s9 = smov (!%p329_p4, %s1319_s9), 31  ;;  %v1560_v5 = vld [vmem:[%s1951_s1 + $0x28] sm:$0xff] }
   0xd   : > { %v1570_v1 = vld [vmem:[%s1951_s1 + $0x78] sm:$0xff]  ;;  %1636 = vset.pattern.permute.xlu0 %v1664_v2  ;;  %1637 = vset.pattern.permute.xlu1 %v1664_v2  ;;  %v1569_v4 = vld [vmem:[%s1951_s1 + $0x70] sm:$0xff]  ;;  %s1738_s14 = sshll.u32 %s1963_s9, 3  ;;  %v1568_v6 = vld [vmem:[%s1951_s1 + $0x68] sm:$0xff]  ;;  %s1323_s16 = sshll.u32 %s1963_s9, 2 }
   0xe   : > { %622 = vmatpush.bf16.msra.mxu0 %v1562_v0  ;;  %671 = vmatpush.bf16.msra.mxu1 %v1570_v1  ;;  %s1744_s17 = scalar_lea.vmem %s1953_s3, %s1738_s14  ;;  %v1559_v9 = vld [vmem:[%s1951_s1 + $0x20] sm:$0xff]  ;;  %v1558_v12 = vld [vmem:[%s1951_s1 + $0x18] sm:$0xff]  ;;  %v1557_v15 = vld [vmem:[%s1951_s1 + $0x10] sm:$0xff]  ;;  %s1779_s19 = scalar_lea.vmem %s1950_s0, %s1738_s14 }
   0xf   : > { %1638 = vset.pattern.permute.xlu2 %v1664_v2  ;;  %v771_v7 = vld [vmem:[%s1744_s17] sm:$0xff]  ;;  %v773_v8 = vld [vmem:[%s1744_s17 + $0x10] sm:$0xff]  ;;  %v772_v11 = vld [vmem:[%s1744_s17 + $0x8] sm:$0xff]  ;;  %s1872_s21 = scalar_lea.vmem %s1952_s2, %s1323_s16  ;;  %s1907_s12 = scalar_lea.vmem %s1957_s7, %s1738_s14 }
  0x10   : > { %789 = vperm.xlu0 %1636, %v771_v7   ;;  %799 = vperm.xlu1 %1637, %v773_v8   ;;  %v1567_v10 = vld [vmem:[%s1951_s1 + $0x60] sm:$0xff]  ;;  %v1566_v13 = vld [vmem:[%s1951_s1 + $0x58] sm:$0xff]  ;;  %v1565_v16 = vld [vmem:[%s1951_s1 + $0x50] sm:$0xff] }
  0x11   : > { %v774_v14 = vld [vmem:[%s1744_s17 + $0x18] sm:$0xff]  ;;  %v777_v17 = vld [vmem:[%s1744_s17 + $0x30] sm:$0xff]  ;;  %v1556_v18 = vld [vmem:[%s1951_s1 + $0x8] sm:$0xff] }
  0x12   : > { %623 = vmatpush.bf16.msra.mxu0 %v1561_v3  ;;  %672 = vmatpush.bf16.msra.mxu1 %v1569_v4  ;;  %v1564_v19 = vld [vmem:[%s1951_s1 + $0x48] sm:$0xff]  ;;  %v778_v20 = vld [vmem:[%s1744_s17 + $0x38] sm:$0xff]  ;;  %v1555_v21 = vld [vmem:[%s1951_s1] sm:$0xff] }
  0x13   : > { %v1563_v22 = vld [vmem:[%s1951_s1 + $0x40] sm:$0xff]  ;;  %v1572_v24 = vld [vmem:[%s1779_s19 + $0x4] sm:$0xf0]  ;;  %v1332_v26 = vld [vmem:[%s1779_s19 + $0x8] sm:$0xf0] }
  0x14   : > { %v1330_v23 = vld [vmem:[%s1779_s19] sm:$0xf]  ;;  %v1571_v25 = vld [vmem:[%s1779_s19 + $0x4] sm:$0xf]  ;;  %v780_v27 = vld [vmem:[%s1744_s17 + $0x48] sm:$0xff] }
  0x15   : > { %v1331_v28 = vor.u32 %v1572_v24, %v1330_v23  ;;  %v1335_v29 = vor.u32 %v1571_v25, %v1332_v26  ;;  %v781_v30 = vld [vmem:[%s1744_s17 + $0x50] sm:$0xff]  ;;  %v775_v31 = vld [vmem:[%s1744_s17 + $0x20] sm:$0xff]  ;;  %v784_v33 = vld [vmem:[%s1744_s17 + $0x68] sm:$0xff] }
  0x16   : > { %624 = vmatpush.bf16.msra.mxu0 %v1560_v5  ;;  %673 = vmatpush.bf16.msra.mxu1 %v1568_v6  ;;  %v783_v32 = vld [vmem:[%s1744_s17 + $0x60] sm:$0xff]  ;;  %v776_v34 = vld [vmem:[%s1744_s17 + $0x28] sm:$0xff]  ;;  %v1338_v35 = vld [vmem:[%s1779_s19 + $0x10] sm:$0xf] }
  0x17   : > { %809 = vperm.xlu2 %1638, %v775_v31   ;;  %v1574_v36 = vld [vmem:[%s1779_s19 + $0x14] sm:$0xf0]  ;;  %v1573_v37 = vld [vmem:[%s1779_s19 + $0x14] sm:$0xf]  ;;  %v1340_v38 = vld [vmem:[%s1779_s19 + $0x18] sm:$0xf0] }
  0x18   : > { %794 = vperm.xlu0 %1636, %v772_v11   ;;  %804 = vperm.xlu1 %1637, %v774_v14   ;;  %v786_v39 = vld [vmem:[%s1744_s17 + $0x78] sm:$0xff]  ;;  %v1339_v40 = vor.u32 %v1574_v36, %v1338_v35  ;;  %v1343_v41 = vor.u32 %v1573_v37, %v1340_v38  ;;  %v779_v42 = vld [vmem:[%s1744_s17 + $0x40] sm:$0xff]  ;;  %v1576_v45 = vld [vmem:[%s1779_s19 + $0x24] sm:$0xf0] }
  0x19   : > { %v782_v43 = vld [vmem:[%s1744_s17 + $0x58] sm:$0xff]  ;;  %v1346_v44 = vld [vmem:[%s1779_s19 + $0x20] sm:$0xf]  ;;  %v1575_v46 = vld [vmem:[%s1779_s19 + $0x24] sm:$0xf] }
  0x1a   : > { %625 = vmatpush.bf16.msra.mxu0 %v1559_v9  ;;  %674 = vmatpush.bf16.msra.mxu1 %v1567_v10  ;;  %v1348_v47 = vld [vmem:[%s1779_s19 + $0x28] sm:$0xf0]  ;;  %v1347_v48 = vor.u32 %v1576_v45, %v1346_v44  ;;  %v785_v50 = vld [vmem:[%s1744_s17 + $0x70] sm:$0xff]  ;;  %v1578_v52 = vld [vmem:[%s1779_s19 + $0x34] sm:$0xf0] }
  0x1b   : > { %v1351_v49 = vor.u32 %v1575_v46, %v1348_v47  ;;  %v1354_v51 = vld [vmem:[%s1779_s19 + $0x30] sm:$0xf]  ;;  %v1577_v53 = vld [vmem:[%s1779_s19 + $0x34] sm:$0xf]  ;;  %v1356_v54 = vld [vmem:[%s1779_s19 + $0x38] sm:$0xf0] }
  0x1c   : > { %v1355_v55 = vor.u32 %v1578_v52, %v1354_v51  ;;  %v1359_v56 = vor.u32 %v1577_v53, %v1356_v54  ;;  %v1362_v57 = vld [vmem:[%s1779_s19 + $0x40] sm:$0xf]  ;;  %v1580_v58 = vld [vmem:[%s1779_s19 + $0x44] sm:$0xf0]  ;;  %v1579_v59 = vld [vmem:[%s1779_s19 + $0x44] sm:$0xf] }
  0x1d   : > { %v1364_v60 = vld [vmem:[%s1779_s19 + $0x48] sm:$0xf0]  ;;  %v1363_v61 = vor.u32 %v1580_v58, %v1362_v57  ;;  %v1602_v63 = vld [vmem:[%s1954_s4 + $0x38] sm:$0xff]  ;;  %v1601_v0 = vld [vmem:[%s1954_s4 + $0x30] sm:$0xff] }
  0x1e   : > { %626 = vmatpush.bf16.msra.mxu0 %v1558_v12  ;;  %675 = vmatpush.bf16.msra.mxu1 %v1566_v13  ;;  %v1367_v62 = vor.u32 %v1579_v59, %v1364_v60  ;;  %v1370_v1 = vld [vmem:[%s1779_s19 + $0x50] sm:$0xf]  ;;  %v1582_v2 = vld [vmem:[%s1779_s19 + $0x54] sm:$0xf0]  ;;  %v1581_v3 = vld [vmem:[%s1779_s19 + $0x54] sm:$0xf] }
  0x1f   : > { %814 = vperm.xlu2 %1638, %v776_v34   ;;  %1132 = vmatpush.bf16.msra.mxu3 %v1602_v63  ;;  %v1372_v4 = vld [vmem:[%s1779_s19 + $0x58] sm:$0xf0]  ;;  %v1600_v6 = vld [vmem:[%s1954_s4 + $0x28] sm:$0xff]  ;;  %v1371_v7 = vor.u32 %v1582_v2, %v1370_v1  ;;  %v1609_v9 = vld [vmem:[%s1955_s5 + $0x30] sm:$0xff] }
  0x20   : > { %819 = vperm.xlu0 %1636, %v777_v17   ;;  %824 = vperm.xlu1 %1637, %v778_v20   ;;  %v1610_v5 = vld [vmem:[%s1955_s5 + $0x38] sm:$0xff]  ;;  %v1375_v8 = vor.u32 %v1581_v3, %v1372_v4  ;;  %v1599_v10 = vld [vmem:[%s1954_s4 + $0x20] sm:$0xff]  ;;  %v1608_v11 = vld [vmem:[%s1955_s5 + $0x28] sm:$0xff] }
  0x21   : > { %987 = vmatpush.bf16.msra.mxu2 %v1610_v5  ;;  %v1598_v12 = vld [vmem:[%s1954_s4 + $0x18] sm:$0xff]  ;;  %v1607_v13 = vld [vmem:[%s1955_s5 + $0x20] sm:$0xff]  ;;  %v1597_v14 = vld [vmem:[%s1954_s4 + $0x10] sm:$0xff] }
  0x22   : > { %627 = vmatpush.bf16.msra.mxu0 %v1557_v15  ;;  %676 = vmatpush.bf16.msra.mxu1 %v1565_v16  ;;  %v1378_v15 = vld [vmem:[%s1779_s19 + $0x60] sm:$0xf]  ;;  %v1584_v16 = vld [vmem:[%s1779_s19 + $0x64] sm:$0xf0]  ;;  %v1583_v17 = vld [vmem:[%s1779_s19 + $0x64] sm:$0xf] }
  0x23   : > { %1133 = vmatpush.bf16.msra.mxu3 %v1601_v0  ;;  %v1596_v20 = vld [vmem:[%s1954_s4 + $0x8] sm:$0xff]  ;;  %v1605_v23 = vld [vmem:[%s1955_s5 + $0x10] sm:$0xff]  ;;  %v1595_v24 = vld [vmem:[%s1954_s4] sm:$0xff] }
  0x24   : > { %v1587_v25 = vld [vmem:[%s1872_s21] sm:$0xff]  ;;  %v1604_v26 = vld [vmem:[%s1955_s5 + $0x8] sm:$0xff]  ;;  %v1388_v31 = vld [vmem:[%s1779_s19 + $0x78] sm:$0xf0] }
  0x25   : > { %988 = vmatpush.bf16.msra.mxu2 %v1609_v9  ;;  %v1588_v34 = vld [vmem:[%s1872_s21 + $0x8] sm:$0xff]  ;;  %v1589_v38 = vld [vmem:[%s1872_s21 + $0x10] sm:$0xff] }
  0x26   : > { %628 = vmatpush.bf16.msra.mxu0 %v1556_v18  ;;  %677 = vmatpush.bf16.msra.mxu1 %v1564_v19  ;;  %v1380_v18 = vld [vmem:[%s1779_s19 + $0x68] sm:$0xf0]  ;;  %v1606_v19 = vld [vmem:[%s1955_s5 + $0x18] sm:$0xff] }
  0x27   : > { %829 = vperm.xlu2 %1638, %v779_v42   ;;  %1134 = vmatpush.bf16.msra.mxu3 %v1600_v6  ;;  %v1592_v9 = vld [vmem:[%s1872_s21 + $0x28] sm:$0xff] }
  0x28   : > { %834 = vperm.xlu0 %1636, %v780_v27   ;;  %839 = vperm.xlu1 %1637, %v781_v30   ;;  %v1603_v27 = vld [vmem:[%s1955_s5] sm:$0xff]  ;;  %v1585_v30 = vld [vmem:[%s1779_s19 + $0x74] sm:$0xf] }
  0x29   : > { %989 = vmatpush.bf16.msra.mxu2 %v1608_v11 }
  0x2a   : > { %629 = vmatpush.bf16.msra.mxu0 %v1555_v21  ;;  %678 = vmatpush.bf16.msra.mxu1 %v1563_v22  ;;  %v1379_v21 = vor.u32 %v1584_v16, %v1378_v15  ;;  %v1383_v22 = vor.u32 %v1583_v17, %v1380_v18 }
  0x2b   : > { %1135 = vmatpush.bf16.msra.mxu3 %v1599_v10 }
  0x2d   : > { %630 = vmatmul.bf16.vlgmr.msra.gmra.mxu0 %v1331_v28  ;;  %679 = vmatmul.bf16.vlgmr.msra.gmra.mxu1 %v1335_v29  ;;  %v1386_v28 = vld [vmem:[%s1779_s19 + $0x70] sm:$0xf]  ;;  %v1586_v29 = vld [vmem:[%s1779_s19 + $0x74] sm:$0xf0] }
  0x2e   : > { %990 = vmatpush.bf16.msra.mxu2 %v1607_v13 }
  0x2f   : > { %844 = vperm.xlu2 %1638, %v782_v43   ;;  %1136 = vmatpush.bf16.msra.mxu3 %v1598_v12 }
  0x30   : > { %849 = vperm.xlu0 %1636, %v783_v32   ;;  %854 = vperm.xlu1 %1637, %v784_v33   ;;  %v1387_v32 = vor.u32 %v1586_v29, %v1386_v28  ;;  %v1391_v33 = vor.u32 %v1585_v30, %v1388_v31 }
  0x32   : > { %991 = vmatpush.bf16.msra.mxu2 %v1606_v19 }
  0x33   : > { %1137 = vmatpush.bf16.msra.mxu3 %v1597_v14 }
  0x36   : > { %992 = vmatpush.bf16.msra.mxu2 %v1605_v23 }
  0x37   : > { %859 = vperm.xlu2 %1638, %v785_v50   ;;  %1138 = vmatpush.bf16.msra.mxu3 %v1596_v20  ;;  %v1590_v50 = vld [vmem:[%s1872_s21 + $0x18] sm:$0xff] }
  0x38   : > { %864 = vperm.xlu0 %1636, %v786_v39  }
  0x3a   : > { %993 = vmatpush.bf16.msra.mxu2 %v1604_v26 }
  0x3b   : > { %1139 = vmatpush.bf16.msra.mxu3 %v1595_v24 }
  0x3d   : > { %635 = vmatmul.bf16.gmra.mxu0 %v1339_v40  ;;  %684 = vmatmul.bf16.gmra.mxu1 %v1343_v41 }
  0x3e   : > { %1140 = vmatmul.bf16.vlgmr.msra.gmra.mxu3 %v1587_v25  ;;  %994 = vmatpush.bf16.msra.mxu2 %v1603_v27 }
  0x4d   : > { %640 = vmatmul.bf16.gmra.mxu0 %v1347_v48  ;;  %689 = vmatmul.bf16.gmra.mxu1 %v1351_v49 }
  0x4e   : > { %1145 = vmatmul.bf16.gmra.mxu3 %v1588_v34 }
  0x5d   : > { %645 = vmatmul.bf16.gmra.mxu0 %v1355_v55  ;;  %694 = vmatmul.bf16.gmra.mxu1 %v1359_v56 }
  0x5e   : > { %1150 = vmatmul.bf16.gmra.mxu3 %v1589_v38 }
  0x6d   : > { %650 = vmatmul.bf16.gmra.mxu0 %v1363_v61  ;;  %699 = vmatmul.bf16.gmra.mxu1 %v1367_v62  ;;  %v1591_v62 = vld [vmem:[%s1872_s21 + $0x20] sm:$0xff] }
  0x6e   : > { %1155 = vmatmul.bf16.gmra.mxu3 %v1590_v50 }
  0x71   : > { %v810_v59 = vpop.permute.xlu2 %809 }
  0x79   : > { %v815_v3 = vpop.permute.xlu2 %814 }
  0x7d   : > { %655 = vmatmul.bf16.gmra.mxu0 %v1371_v7  ;;  %704 = vmatmul.bf16.gmra.mxu1 %v1375_v8 }
  0x7e   : > { %1160 = vmatmul.bf16.gmra.mxu3 %v1591_v62 }
  0x81   : > { %v830_v27 = vpop.permute.xlu2 %829 }
  0x82   : > { %v790_v35 = vpop.permute.xlu0 %789  ;;  %v800_v47 = vpop.permute.xlu1 %799 }
  0x8a   : > { %v795_v43 = vpop.permute.xlu0 %794  ;;  %v805_v55 = vpop.permute.xlu1 %804 }
  0x8d   : > { %660 = vmatmul.bf16.gmra.mxu0 %v1379_v21  ;;  %709 = vmatmul.bf16.gmra.mxu1 %v1383_v22  ;;  %v1593_v21 = vld [vmem:[%s1872_s21 + $0x30] sm:$0xff] }
  0x8e   : > { %1165 = vmatmul.bf16.gmra.mxu3 %v1592_v9 }
  0x92   : > { %v820_v14 = vpop.permute.xlu0 %819  ;;  %v825_v15 = vpop.permute.xlu1 %824 }
  0x9a   : > { %v835_v26 = vpop.permute.xlu0 %834  ;;  %v840_v38 = vpop.permute.xlu1 %839 }
  0x9d   : > { %665 = vmatmul.bf16.gmra.mxu0 %v1387_v32  ;;  %714 = vmatmul.bf16.gmra.mxu1 %v1391_v33  ;;  %v1594_v33 = vld [vmem:[%s1872_s21 + $0x38] sm:$0xff] }
  0x9e   : > { %1170 = vmatmul.bf16.gmra.mxu3 %v1593_v21 }
  0xa2   : > { %v855_v50 = vpop.permute.xlu1 %854 }
  0xaa   : > { %v631_v36 = vpop.f32.mrf.mxu0  ;;  %v680_v37 = vpop.f32.mrf.mxu1 }
  0xab   : > { %v681_v39 = vadd.f32 %v680_v37, %v631_v36 }
  0xad   : > { %v867_v44 = vmul.f32 %v790_v35, %v681_v39  ;;  %v845_v39 = vpop.permute.xlu2 %844 }
  0xae   : > { %1175 = vmatmul.bf16.gmra.mxu3 %v1594_v33 }
  0xb2   : > { %v633_v40 = vpop.f32.mrf.mxu0  ;;  %v682_v41 = vpop.f32.mrf.mxu1 }
  0xb3   : > { %v683_v42 = vadd.f32 %v682_v41, %v633_v40 }
  0xb5   : > { %v868_v45 = vmul.f32 %v795_v43, %v683_v42  ;;  %v860_v62 = vpop.permute.xlu2 %859 }
  0xb7   : > { %v883_v46 = vpack.c.bf16 %v868_v45, %v867_v44 }
  0xb9   : > { %995 = vmatmul.bf16.vlgmr.msra.gmra.mxu2 %v883_v46 }
  0xba   : > { %v636_v48 = vpop.f32.mrf.mxu0  ;;  %v685_v49 = vpop.f32.mrf.mxu1 }
  0xbb   : > { %v686_v51 = vadd.f32 %v685_v49, %v636_v48  ;;  %v850_v49 = vpop.permute.xlu0 %849 }
  0xbd   : > { %v869_v56 = vmul.f32 %v800_v47, %v686_v51 }
  0xc2   : > { %v638_v52 = vpop.f32.mrf.mxu0  ;;  %v687_v53 = vpop.f32.mrf.mxu1 }
  0xc3   : > { %v688_v54 = vadd.f32 %v687_v53, %v638_v52 }
  0xc5   : > { %v870_v57 = vmul.f32 %v805_v55, %v688_v54 }
  0xc7   : > { %v884_v58 = vpack.c.bf16 %v870_v57, %v869_v56  ;;  %v1141_v56 = vpop.f32.mrf.mxu3 }
  0xc9   : > { %1000 = vmatmul.bf16.gmra.mxu2 %v884_v58 }
  0xca   : > { %v641_v60 = vpop.f32.mrf.mxu0  ;;  %v690_v61 = vpop.f32.mrf.mxu1 }
  0xcb   : > { %v691_v63 = vadd.f32 %v690_v61, %v641_v60  ;;  %v865_v61 = vpop.permute.xlu0 %864 }
  0xcd   : > { %v871_v4 = vmul.f32 %v810_v59, %v691_v63 }
  0xd2   : > { %v643_v0 = vpop.f32.mrf.mxu0  ;;  %v692_v1 = vpop.f32.mrf.mxu1 }
  0xd3   : > { %v693_v2 = vadd.f32 %v692_v1, %v643_v0 }
  0xd5   : > { %v872_v5 = vmul.f32 %v815_v3, %v693_v2  ;;  %v1143_v2 = vpop.f32.mrf.mxu3 }
  0xd7   : > { %v885_v6 = vpack.c.bf16 %v872_v5, %v871_v4  ;;  %v1901_v4 = vld [vmem:[%s1956_s6] ss:$0 sm:$0xff] }
  0xd9   : > { %1005 = vmatmul.bf16.gmra.mxu2 %v885_v6 }
  0xda   : > { %v646_v7 = vpop.f32.mrf.mxu0  ;;  %v695_v8 = vpop.f32.mrf.mxu1 }
  0xdb   : > { %v696_v10 = vadd.f32 %v695_v8, %v646_v7 }
  0xdd   : > { %v873_v16 = vmul.f32 %v820_v14, %v696_v10  ;;  %v1146_v3 = vpop.f32.mrf.mxu3 }
  0xe2   : > { %v648_v11 = vpop.f32.mrf.mxu0  ;;  %v697_v12 = vpop.f32.mrf.mxu1 }
  0xe3   : > { %v698_v13 = vadd.f32 %v697_v12, %v648_v11 }
  0xe5   : > { %v874_v17 = vmul.f32 %v825_v15, %v698_v13  ;;  %v1148_v6 = vpop.f32.mrf.mxu3 }
  0xe7   : > { %v886_v18 = vpack.c.bf16 %v874_v17, %v873_v16 }
  0xe9   : > { %1010 = vmatmul.bf16.gmra.mxu2 %v886_v18 }
  0xea   : > { %v651_v19 = vpop.f32.mrf.mxu0  ;;  %v700_v20 = vpop.f32.mrf.mxu1 }
  0xeb   : > { %v701_v22 = vadd.f32 %v700_v20, %v651_v19 }
  0xed   : > { %v875_v28 = vmul.f32 %v830_v27, %v701_v22  ;;  %v1151_v11 = vpop.f32.mrf.mxu3 }
  0xf2   : > { %v653_v23 = vpop.f32.mrf.mxu0  ;;  %v702_v24 = vpop.f32.mrf.mxu1 }
  0xf3   : > { %v703_v25 = vadd.f32 %v702_v24, %v653_v23 }
  0xf5   : > { %v876_v29 = vmul.f32 %v835_v26, %v703_v25  ;;  %v1153_v16 = vpop.f32.mrf.mxu3 }
  0xf7   : > { %v887_v30 = vpack.c.bf16 %v876_v29, %v875_v28 }
  0xf9   : > { %1015 = vmatmul.bf16.gmra.mxu2 %v887_v30 }
  0xfa   : > { %v656_v31 = vpop.f32.mrf.mxu0  ;;  %v705_v32 = vpop.f32.mrf.mxu1 }
  0xfb   : > { %v706_v34 = vadd.f32 %v705_v32, %v656_v31 }
  0xfd   : > { %v877_v40 = vmul.f32 %v840_v38, %v706_v34  ;;  %v1156_v20 = vpop.f32.mrf.mxu3 }
 0x102   : > { %v658_v35 = vpop.f32.mrf.mxu0  ;;  %v707_v36 = vpop.f32.mrf.mxu1 }
 0x103   : > { %v708_v37 = vadd.f32 %v707_v36, %v658_v35 }
 0x105   : > { %v878_v41 = vmul.f32 %v845_v39, %v708_v37  ;;  %v1158_v25 = vpop.f32.mrf.mxu3 }
 0x107   : > { %v888_v42 = vpack.c.bf16 %v878_v41, %v877_v40 }
 0x109   : > { %1020 = vmatmul.bf16.gmra.mxu2 %v888_v42 }
 0x10a   : > { %v661_v43 = vpop.f32.mrf.mxu0  ;;  %v710_v44 = vpop.f32.mrf.mxu1 }
 0x10b   : > { %v711_v45 = vadd.f32 %v710_v44, %v661_v43 }
 0x10d   : > { %v879_v51 = vmul.f32 %v850_v49, %v711_v45  ;;  %v1161_v30 = vpop.f32.mrf.mxu3 }
 0x112   : > { %v663_v46 = vpop.f32.mrf.mxu0  ;;  %v712_v47 = vpop.f32.mrf.mxu1 }
 0x113   : > { %v713_v48 = vadd.f32 %v712_v47, %v663_v46 }
 0x115   : > { %v880_v52 = vmul.f32 %v855_v50, %v713_v48  ;;  %v1163_v35 = vpop.f32.mrf.mxu3 }
 0x117   : > { %v889_v53 = vpack.c.bf16 %v880_v52, %v879_v51 }
 0x119   : > { %1025 = vmatmul.bf16.gmra.mxu2 %v889_v53 }
 0x11a   : > { %v666_v54 = vpop.f32.mrf.mxu0  ;;  %v715_v55 = vpop.f32.mrf.mxu1 }
 0x11b   : > { %v716_v57 = vadd.f32 %v715_v55, %v666_v54 }
 0x11d   : > { %v881_v63 = vmul.f32 %v860_v62, %v716_v57  ;;  %v1166_v39 = vpop.f32.mrf.mxu3 }
 0x122   : > { %v668_v58 = vpop.f32.mrf.mxu0  ;;  %v717_v59 = vpop.f32.mrf.mxu1 }
 0x123   : > { %v718_v60 = vadd.f32 %v717_v59, %v668_v58 }
 0x125   : > { %v882_v0 = vmul.f32 %v865_v61, %v718_v60  ;;  %v1168_v44 = vpop.f32.mrf.mxu3 }
 0x127   : > { %v890_v1 = vpack.c.bf16 %v882_v0, %v881_v63 }
 0x129   : > { %1030 = vmatmul.bf16.gmra.mxu2 %v890_v1 }
 0x12d   : > { %v1171_v49 = vpop.f32.mrf.mxu3 }
 0x135   : > { %v1173_v54 = vpop.f32.mrf.mxu3 }
 0x13c   : > { %v996_v5 = vpop.f32.mrf.mxu2 }
 0x13d   : > { %v1142_v7 = vadd.f32 %v1141_v56, %v996_v5  ;;  %v1176_v58 = vpop.f32.mrf.mxu3 }
 0x13f   : > { %v1185_v8 = vadd.f32 %v1901_v4, %v1142_v7 }
 0x141   : > { %1201 = vst [vmem:[%s1907_s12] sm:$0xff] %v1185_v8 }
 0x144   : > { %v998_v9 = vpop.f32.mrf.mxu2 }
 0x145   : > { %v1144_v10 = vadd.f32 %v1143_v2, %v998_v9  ;;  %v1178_v62 = vpop.f32.mrf.mxu3 }
 0x147   : > { %v1186_v12 = vadd.f32 %v1901_v4, %v1144_v10 }
 0x149   : > { %1202 = vst [vmem:[%s1907_s12 + $0x8] sm:$0xff] %v1186_v12 }
 0x14c   : > { %v1001_v13 = vpop.f32.mrf.mxu2 }
 0x14d   : > { %v1147_v14 = vadd.f32 %v1146_v3, %v1001_v13 }
 0x14f   : > { %v1187_v15 = vadd.f32 %v1901_v4, %v1147_v14 }
 0x151   : > { %1203 = vst [vmem:[%s1907_s12 + $0x10] sm:$0xff] %v1187_v15 }
 0x154   : > { %v1003_v17 = vpop.f32.mrf.mxu2 }
 0x155   : > { %v1149_v18 = vadd.f32 %v1148_v6, %v1003_v17 }
 0x157   : > { %v1188_v19 = vadd.f32 %v1901_v4, %v1149_v18 }
 0x159   : > { %1204 = vst [vmem:[%s1907_s12 + $0x18] sm:$0xff] %v1188_v19 }
 0x15c   : > { %v1006_v21 = vpop.f32.mrf.mxu2 }
 0x15d   : > { %v1152_v22 = vadd.f32 %v1151_v11, %v1006_v21 }
 0x15f   : > { %v1189_v23 = vadd.f32 %v1901_v4, %v1152_v22 }
 0x161   : > { %1205 = vst [vmem:[%s1907_s12 + $0x20] sm:$0xff] %v1189_v23 }
 0x164   : > { %v1008_v24 = vpop.f32.mrf.mxu2 }
 0x165   : > { %v1154_v26 = vadd.f32 %v1153_v16, %v1008_v24 }
 0x167   : > { %v1190_v27 = vadd.f32 %v1901_v4, %v1154_v26 }
 0x169   : > { %1206 = vst [vmem:[%s1907_s12 + $0x28] sm:$0xff] %v1190_v27 }
 0x16c   : > { %v1011_v28 = vpop.f32.mrf.mxu2 }
 0x16d   : > { %v1157_v29 = vadd.f32 %v1156_v20, %v1011_v28 }
 0x16f   : > { %v1191_v31 = vadd.f32 %v1901_v4, %v1157_v29 }
 0x171   : > { %1207 = vst [vmem:[%s1907_s12 + $0x30] sm:$0xff] %v1191_v31 }
 0x174   : > { %v1013_v32 = vpop.f32.mrf.mxu2 }
 0x175   : > { %v1159_v33 = vadd.f32 %v1158_v25, %v1013_v32 }
 0x177   : > { %v1192_v34 = vadd.f32 %v1901_v4, %v1159_v33 }
 0x179   : > { %1208 = vst [vmem:[%s1907_s12 + $0x38] sm:$0xff] %v1192_v34 }
 0x17c   : > { %v1016_v36 = vpop.f32.mrf.mxu2 }
 0x17d   : > { %v1162_v37 = vadd.f32 %v1161_v30, %v1016_v36 }
 0x17f   : > { %v1193_v38 = vadd.f32 %v1901_v4, %v1162_v37 }
 0x181   : > { %1209 = vst [vmem:[%s1907_s12 + $0x40] sm:$0xff] %v1193_v38 }
 0x184   : > { %v1018_v40 = vpop.f32.mrf.mxu2 }
 0x185   : > { %v1164_v41 = vadd.f32 %v1163_v35, %v1018_v40 }
 0x187   : > { %v1194_v42 = vadd.f32 %v1901_v4, %v1164_v41 }
 0x189   : > { %1210 = vst [vmem:[%s1907_s12 + $0x48] sm:$0xff] %v1194_v42 }
 0x18c   : > { %v1021_v43 = vpop.f32.mrf.mxu2 }
 0x18d   : > { %v1167_v45 = vadd.f32 %v1166_v39, %v1021_v43 }
 0x18f   : > { %v1195_v46 = vadd.f32 %v1901_v4, %v1167_v45 }
 0x191   : > { %1211 = vst [vmem:[%s1907_s12 + $0x50] sm:$0xff] %v1195_v46 }
 0x194   : > { %v1023_v47 = vpop.f32.mrf.mxu2 }
 0x195   : > { %v1169_v48 = vadd.f32 %v1168_v44, %v1023_v47 }
 0x197   : > { %v1196_v50 = vadd.f32 %v1901_v4, %v1169_v48 }
 0x199   : > { %1212 = vst [vmem:[%s1907_s12 + $0x58] sm:$0xff] %v1196_v50 }
 0x19c   : > { %v1026_v51 = vpop.f32.mrf.mxu2 }
 0x19d   : > { %v1172_v52 = vadd.f32 %v1171_v49, %v1026_v51 }
 0x19f   : > { %v1197_v53 = vadd.f32 %v1901_v4, %v1172_v52 }
 0x1a1   : > { %1213 = vst [vmem:[%s1907_s12 + $0x60] sm:$0xff] %v1197_v53 }
 0x1a4   : > { %v1028_v55 = vpop.f32.mrf.mxu2 }
 0x1a5   : > { %v1174_v56 = vadd.f32 %v1173_v54, %v1028_v55 }
 0x1a7   : > { %v1198_v57 = vadd.f32 %v1901_v4, %v1174_v56 }
 0x1a9   : > { %1214 = vst [vmem:[%s1907_s12 + $0x68] sm:$0xff] %v1198_v57 }
 0x1ac   : > { %v1031_v59 = vpop.f32.mrf.mxu2 }
 0x1ad   : > { %v1177_v60 = vadd.f32 %v1176_v58, %v1031_v59 }
 0x1af   : > { %v1199_v61 = vadd.f32 %v1901_v4, %v1177_v60 }
 0x1b1   : > { %1215 = vst [vmem:[%s1907_s12 + $0x70] sm:$0xff] %v1199_v61 }
 0x1b4   : > { %v1033_v63 = vpop.f32.mrf.mxu2 }
 0x1b5   : > { %v1179_v0 = vadd.f32 %v1178_v62, %v1033_v63 }
 0x1b7   : > { %v1200_v1 = vadd.f32 %v1901_v4, %v1179_v0 }
 0x1b9   : > { %1216 = vst [vmem:[%s1907_s12 + $0x78] sm:$0xff] %v1200_v1 }
 0x1ba PF: > { %s17_s26 = sadd.s32 1, %s1662_s26   ;;  %s1958_s24 = smov %s1658_s25 }
 0x1bb   : > { %p14_p5 = scmp.ge.s32.totalorder %s17_s26, 4   ;;  %s1959_s25 = smov %s1961_s27 }
 0x1bd   :  { %16 = sbr.rel (!%p14_p5) target bundleno = 2 (0x2), region = 93 }

</bundles_post_ra>
